<compile_context>
chip_gen: v6e
topology: v6e:2x2x1
jax: 0.10.0
libtpu: 0.0.40
codegen_flags: <defaults>
</compile_context>

<pallas_src>
import functools

import jax
import jax.numpy as jnp
from jax.experimental import pallas as pl
from jax.experimental.pallas import tpu as pltpu


def _bpmll_kernel(c_ref, y_ref, loss_ref, *, bias, n_labels, approx_recip):
    """Per-row BP-MLL loss for one (TB, L) tile of the batch."""
    c = c_ref[...].astype(jnp.float32)          # (TB, L)
    y = y_ref[...].astype(jnp.float32)          # (TB, L) 0/1 mask

    # Per-row shift: both exponential factors stay bounded by the intra-row
    # range of c (same overflow threshold as the PyTorch reference).
    c_max = jnp.max(c, axis=1, keepdims=True)   # (TB, 1)
    e = jnp.exp(c - c_max)                      # (TB, L), in (0, 1]
    # exp(c_max - c) without a second full exp (EUP: 1 exp + 1 reciprocal).
    inv_e = pl.reciprocal(e, approx=approx_recip)

    y_sum = jnp.sum(y, axis=1, keepdims=True)          # |Y_i|
    a = jnp.sum(y * inv_e, axis=1, keepdims=True)      # sum_{k in Y} exp(c_max - c_k)
    b = (jnp.sum(e, axis=1, keepdims=True)
         - jnp.sum(y * e, axis=1, keepdims=True))      # sum_{l in Ybar} exp(c_l - c_max)
    pairwise = a * b                                   # the exp(c_max) shifts cancel exactly

    y_norm = y_sum if bias[0] == 1 else y_sum ** bias[0]
    y_bar_sum = n_labels - y_sum                       # |Ybar_i| without materializing y_bar
    y_bar_norm = y_bar_sum if bias[1] == 1 else y_bar_sum ** bias[1]

    loss_ref[...] = pairwise / (y_norm * y_bar_norm)   # (TB, 1)


def _pick_block_b(B, L, c_bytes, y_bytes, block_b=None,
                  input_vmem_budget=4 * 1024 * 1024):
    """Largest batch tile that divides B, keeps sublane alignment (multiple of
    8, or the full batch) and keeps 2 inputs x 2 pipeline buffers within a
    conservative VMEM budget."""
    if block_b is not None:
        if B % block_b != 0 or not (block_b % 8 == 0 or block_b == B):
            raise ValueError(f"block_b={block_b} must divide B={B} and be a "
                             "multiple of 8 (or equal B)")
        return block_b
    per_row = 2 * L * (c_bytes + y_bytes)   # 2 pipeline buffers x both inputs
    cap = max(8, input_vmem_budget // max(per_row, 1))
    if B <= cap:
        return B
    tb = (min(cap, B) // 8) * 8
    while tb >= 8:
        if B % tb == 0:
            return tb
        tb -= 8
    # TODO(synk): pad the batch to a multiple of 8 instead of falling back to
    # a single monolithic block when B has no suitable divisor.
    return B


def bpmll_loss(c: jax.Array, y: jax.Array, *, bias=(1, 1), reduction="mean",
               block_b=None, approx_reciprocal=False) -> jax.Array:
    """BP-MLL loss. c, y: (B, L); y is a 0/1 multi-label mask (f32/bf16/...).

    reduction='mean' -> scalar f32; reduction='none' -> (B,) f32.
    approx_reciprocal=True uses the EUP vrcp (bf16-class accuracy) for extra
    transcendental headroom on v5e/v6e; default keeps full f32 precision.
    """
    B, L = c.shape
    assert y.shape == (B, L), (c.shape, y.shape)
    tb = _pick_block_b(B, L, jnp.dtype(c.dtype).itemsize,
                       jnp.dtype(y.dtype).itemsize, block_b)
    nb = B // tb

    kernel = functools.partial(
        _bpmll_kernel, bias=tuple(int(b) for b in bias), n_labels=float(L),
        approx_recip=approx_reciprocal)

    # TODO(synk): for very large L also tile the label axis (inner "arbitrary"
    # grid axis with (tb, 1) accumulators + online max); here one (tb, L)
    # block of the full label axis is assumed to fit VMEM.
    per_row = pl.pallas_call(
        kernel,
        out_shape=jax.ShapeDtypeStruct((B, 1), jnp.float32),
        grid_spec=pltpu.PrefetchScalarGridSpec(
            num_scalar_prefetch=0,
            grid=(nb,),
            in_specs=[
                pl.BlockSpec((tb, L), lambda i: (i, 0)),
                pl.BlockSpec((tb, L), lambda i: (i, 0)),
            ],
            out_specs=pl.BlockSpec((tb, 1), lambda i: (i, 0)),
        ),
        compiler_params=pltpu.CompilerParams(
            dimension_semantics=("parallel",)),
    )(c, y)

    if reduction == "mean":
        return jnp.mean(per_row)
    elif reduction == "none":
        return per_row[:, 0]
    raise ValueError(f"unsupported reduction: {reduction!r}")


def _bpmll_ref(c, y, bias=(1, 1), reduction="mean"):
    """Pure-JAX reference mirroring the PyTorch forward (pairwise matrix)."""
    c = c.astype(jnp.float32)
    y = y.astype(jnp.float32)
    y_bar = 1.0 - y
    y_norm = jnp.sum(y, axis=1) ** bias[0]
    y_bar_norm = jnp.sum(y_bar, axis=1) ** bias[1]
    truth = y[:, :, None] * y_bar[:, None, :]
    expm = jnp.exp(c[:, None, :] - c[:, :, None])
    pairwise = jnp.sum(truth * expm, axis=(1, 2))
    loss = pairwise / (y_norm * y_bar_norm)
    return jnp.mean(loss) if reduction == "mean" else loss


if __name__ == "__main__":
    key = jax.random.PRNGKey(0)
    kc, ky = jax.random.split(key)

    B, L = 32, 128
    c = jax.random.normal(kc, (B, L), dtype=jnp.float32)
    y = jax.random.bernoulli(ky, 0.3, (B, L)).astype(jnp.float32)
    # every instance needs at least one positive and one negative label
    y = y.at[:, 0].set(1.0).at[:, 1].set(0.0)
    y_bf16 = y.astype(jnp.bfloat16)   # 0/1 mask: lossless in bf16, halves HBM bytes

    # default (mean), forced 8-row tiles -> grid (4,), parallel batch axis
    out_mean = jax.block_until_ready(bpmll_loss(c, y_bf16, block_b=8))
    ref_mean = jax.block_until_ready(_bpmll_ref(c, y))
    assert jnp.allclose(out_mean, ref_mean, rtol=1e-4, atol=1e-6), (out_mean, ref_mean)

    # reduction='none' with a non-unit integer bias
    out_none = jax.block_until_ready(
        bpmll_loss(c, y_bf16, bias=(2, 1), reduction="none", block_b=8))
    ref_none = jax.block_until_ready(_bpmll_ref(c, y, bias=(2, 1), reduction="none"))
    assert jnp.allclose(out_none, ref_none, rtol=1e-4, atol=1e-6), (out_none, ref_none)

    # approximate-reciprocal path (less EUP pressure, bf16-class accuracy)
    out_approx = jax.block_until_ready(
        bpmll_loss(c, y_bf16, block_b=8, approx_reciprocal=True))
    assert jnp.allclose(out_approx, ref_mean, rtol=2e-2, atol=1e-4), (out_approx, ref_mean)

    print("KERNEL_OK")
</pallas_src>

<mosaic_0001>
module attributes {stable_mosaic.version = 11 : i64} {
  func.func @_bpmll_kernel(%arg0: i32, %arg1: memref<8x128xf32, #tpu.memory_space<vmem>>, %arg2: memref<8x128xbf16, #tpu.memory_space<vmem>>, %arg3: memref<8x1xf32, #tpu.memory_space<vmem>>) attributes {dimension_semantics = [#tpu.dimension_semantics<parallel>], iteration_bounds = array<i64: 4>, scalar_prefetch = 0 : i64, scratch_operands = 0 : i64, tpu.core_type = #tpu.core_type<tc>, window_params = [{transform_indices = @transform_0, window_bounds = array<i64: 8, 128>}, {transform_indices = @transform_1, window_bounds = array<i64: 8, 128>}, {transform_indices = @transform_2, window_bounds = array<i64: 8, 1>}]} {
    %c0 = arith.constant 0 : index
    %c0_0 = arith.constant 0 : index
    %0 = vector.load %arg1[%c0, %c0_0] : memref<8x128xf32, #tpu.memory_space<vmem>>, vector<8x128xf32>
    %c0_1 = arith.constant 0 : index
    %c0_2 = arith.constant 0 : index
    %1 = vector.load %arg2[%c0_1, %c0_2] : memref<8x128xbf16, #tpu.memory_space<vmem>>, vector<8x128xbf16>
    %2 = arith.extf %1 : vector<8x128xbf16> to vector<8x128xf32>
    %cst = arith.constant dense<0xFF800000> : vector<8xf32>
    %3 = vector.multi_reduction <maximumf>, %0, %cst [1] : vector<8x128xf32> to vector<8xf32>
    %4 = vector.shape_cast %3 : vector<8xf32> to vector<8x1xf32>
    %5 = vector.broadcast %4 : vector<8x1xf32> to vector<8x128xf32>
    %6 = arith.subf %0, %5 : vector<8x128xf32>
    %7 = math.exp %6 : vector<8x128xf32>
    %8 = tpu.reciprocal %7 : vector<8x128xf32> -> vector<8x128xf32>
    %cst_3 = arith.constant dense<0.000000e+00> : vector<8xf32>
    %9 = vector.multi_reduction <add>, %2, %cst_3 [1] : vector<8x128xf32> to vector<8xf32>
    %10 = vector.shape_cast %9 : vector<8xf32> to vector<8x1xf32>
    %11 = arith.mulf %2, %8 : vector<8x128xf32>
    %cst_4 = arith.constant dense<0.000000e+00> : vector<8xf32>
    %12 = vector.multi_reduction <add>, %11, %cst_4 [1] : vector<8x128xf32> to vector<8xf32>
    %13 = vector.shape_cast %12 : vector<8xf32> to vector<8x1xf32>
    %cst_5 = arith.constant dense<0.000000e+00> : vector<8xf32>
    %14 = vector.multi_reduction <add>, %7, %cst_5 [1] : vector<8x128xf32> to vector<8xf32>
    %15 = vector.shape_cast %14 : vector<8xf32> to vector<8x1xf32>
    %16 = arith.mulf %2, %7 : vector<8x128xf32>
    %cst_6 = arith.constant dense<0.000000e+00> : vector<8xf32>
    %17 = vector.multi_reduction <add>, %16, %cst_6 [1] : vector<8x128xf32> to vector<8xf32>
    %18 = vector.shape_cast %17 : vector<8xf32> to vector<8x1xf32>
    %19 = arith.subf %15, %18 : vector<8x1xf32>
    %20 = arith.mulf %13, %19 : vector<8x1xf32>
    %cst_7 = arith.constant 1.280000e+02 : f32
    %21 = vector.broadcast %cst_7 : f32 to vector<8x1xf32>
    %22 = arith.subf %21, %10 : vector<8x1xf32>
    %23 = arith.mulf %10, %22 : vector<8x1xf32>
    %24 = arith.divf %20, %23 : vector<8x1xf32>
    %c0_8 = arith.constant 0 : index
    %c0_9 = arith.constant 0 : index
    %25 = vector.load %arg3[%c0_8, %c0_9] : memref<8x1xf32, #tpu.memory_space<vmem>>, vector<8x1xf32>
    tpu.vector_store %arg3[%c0_8, %c0_9], %24 {strides = array<i32>} : memref<8x1xf32, #tpu.memory_space<vmem>>, vector<8x1xf32>,
    return
  }
  func.func @transform_0(%arg0: i32) -> (i32, i32) {
    %c0_i32 = arith.constant 0 : i32
    %c0_i32_0 = arith.constant 0 : i32
    return %arg0, %c0_i32 : i32, i32
  }
  func.func @transform_1(%arg0: i32) -> (i32, i32) {
    %c0_i32 = arith.constant 0 : i32
    %c0_i32_0 = arith.constant 0 : i32
    return %arg0, %c0_i32 : i32, i32
  }
  func.func @transform_2(%arg0: i32) -> (i32, i32) {
    %c0_i32 = arith.constant 0 : i32
    %c0_i32_0 = arith.constant 0 : i32
    return %arg0, %c0_i32 : i32, i32
  }
}

</mosaic_0001>

<bundles_post_ra>
// kernel: tpu_custom_call.1
= control target key start
LH: loop header
LB: loop body
LE: loop exit
PB: predicated region body
PF: predicated region fallthrough
CT: control target
= control target key end

     0   :  { %7 = vsyncpa [#allocation3], 0  ;;  %s633_s0 = inlined_call_operand.hbm [shape: f32[32,128], index: 0, kind: input, shape index: {}]   ;;  %s634_s1 = inlined_call_operand.hbm [shape: bf16[32,128], index: 1, kind: input, shape index: {}]   ;;  %s635_s2 = inlined_call_operand.vmem [shape: f32[32,1], index: 2, kind: output, shape index: {}]  }
   0x1   :  { %9 = vsyncpa [#allocation3 + $0x1], 0 }
   0x2   :  { %10 = vsyncpa [#allocation5], 0 }
   0x3   :  { %12 = vsyncpa [#allocation5 + $0x1], 0  ;;  %s487_s9 = smov 0   ;;  %s489_s10 = smov 0  }
   0x4   :  { %s491_s11 = smov 0   ;;  %s493_s12 = smov 0  }
   0x5 LB: > { %s506_s13 = sadd.s32 4294967295, %s468_s12   ;;  %s509_s14 = sadd.s32 1, %s468_s12   ;;  %s468_s12 = sphi %s493_s12, %s647_s12   ;;  %s464_s11 = sphi %s491_s11, %s646_s11   ;;  %s460_s10 = sphi %s489_s10, %s645_s10   ;;  %s456_s9 = sphi %s487_s9, %s644_s9  }
   0x6   : > { %s22_s15 = ssub.s32 %s468_s12, %s509_s14  ;;  %s25_s16 = sadd.s32 1, %s464_s11 }
   0x7   : > { %p23_p0 = scmp.eq.s32.totalorder %s22_s15, 0  ;;  %p32_p1 = scmp.ne.s32.totalorder %s464_s11, %s460_s10 }
   0x8   : > { %p33_p2 = scmp.eq.s32.totalorder %s468_s12, 0  ;;  %p38_p3 = scmp.ne.s32.totalorder %s460_s10, %s456_s9 }
   0x9   : > { %s519_s17 = scalar_select %p23_p0, %s464_s11, %s25_s16  }
   0xa   : > { %p34_p4 = por %p33_p2, %p32_p1  ;;  %p39_p5 = scmp.eq.s32.totalorder %s506_s13, 0 }
   0xb   : > { %p335_p6 = scmp.lt.s32.totalorder %s468_s12, 4  ;;  %s528_s19 = sand.u32 1, %s464_s11  }
   0xc   : > { %p523_p7 = por %p39_p5, %p38_p3  ;;  %s314_s20 = sshll.u32 %s528_s19, 3 }
   0xd   : > { %s315_s21 = sshll.u32 %s468_s12, 7  ;;  %s118_s25 = scalar_lea.vmem [#allocation2], %s314_s20 }
   0xe   : > { %s637_s18 = scalar_select %p523_p7, 1, 0 }
   0xf   : > { %s535_s24 = scalar_lea.hbm %s633_s0, %s315_s21  ;;  %s125_s26 = sshll.u32 %s118_s25, 4  ;;  %s537_s26 = int_to_ptr.vmem [resolvable:$true] %s125_s26 }
  0x10   : > { %p539_p8 = pnand %p335_p6, %p34_p4  ;;  %s115_s28 = scalar_lea.sflag [#allocation3], %s528_s19 }
  0x11   : > { %s374_s29 = scalar_lea.hbm %s535_s24, 128  ;;  %s379_s4 = scalar_lea.hbm %s633_s0, 512 }
  0x12   : > { %p375_p11 = scmp.ne.s32.totalorder %s535_s24, %s374_s29  ;;  %p376_p12 = pneg %p539_p8 }
  0x13   : > { %p380_p1 = scmp.lt.s32.totalorder %s535_s24, %s633_s0  ;;  %p381_p2 = scmp.lt.s32.totalorder %s379_s4, %s374_s29 }
  0x14   : > { %p377_p13 = pnand %p376_p12, %p375_p11 }
  0x15   : > { %p382_p3 = por %p381_p2, %p380_p1 }
  0x16   : > { %p378_p0 = pneg %p377_p13 }
  0x18   : > { %p383_p4 = pnand %p382_p3, %p378_p0 }
  0x1a   : > { %386 = shalt.err (!%p383_p4)
}
  0x1b   : > { %s387_s7 = scalar_lea.vmem %s537_s26, 128  ;;  %s470_s8 = smov [#allocation2]  }
  0x1c   : > { %p388_p5 = scmp.ne.s32.totalorder %s537_s26, %s387_s7  ;;  %s392_s9 = sshll.u32 %s470_s8, 4  ;;  %s393_s9 = int_to_ptr.vmem [resolvable:$false] %s392_s9 }
  0x1d   : > { %s394_s15 = scalar_lea.vmem %s393_s9, 256  ;;  %p395_p13 = scmp.lt.s32.totalorder %s537_s26, %s393_s9 }
  0x1e   : > { %p390_p6 = pnand %p388_p5, %p376_p12  ;;  %p396_p9 = scmp.lt.s32.totalorder %s394_s15, %s387_s7 }
  0x20   : > { %p391_p11 = pneg %p390_p6  ;;  %p397_p10 = por %p396_p9, %p395_p13 }
  0x22   : > { %p398_p1 = pnand %p397_p10, %p391_p11 }
  0x24   : > { %401 = shalt.err (!%p398_p1)
}
  0x25   : > { %331 = dma.hbm_to_vmem [thread:$0]  (!%p539_p8), %s535_s24, 128, %s537_s26, %s115_s28  }
  0x26   : > { %p639_p0 = scmp.lt.s32.totalorder %s468_s12, 5  ;;  %p640_p2 = scmp.ge.s32.totalorder %s468_s12, 1 }
  0x27   : > { %s316_s20 = sshll.u32 %s528_s19, 2  ;;  %s317_s21 = sshll.u32 %s468_s12, 6 }
  0x28   : > { %p574_p3 = pnand %p640_p2, %p639_p0  ;;  %s583_s25 = scalar_lea.hbm %s634_s1, %s317_s21 }
  0x29   : > { %s136_s29 = scalar_lea.vmem [#allocation4], %s316_s20  ;;  %s133_s24 = scalar_lea.sflag [#allocation5], %s528_s19 }
  0x2a   : > { %s641_s16 = scalar_select %p574_p3, 1, 0 }
  0x2b   : > { %s143_s30 = sshll.u32 %s136_s29, 4  ;;  %s402_s26 = scalar_lea.hbm %s583_s25, 64  ;;  %s144_s30 = int_to_ptr.vmem [resolvable:$true] %s143_s30 }
  0x2c   : > { %p403_p9 = scmp.ne.s32.totalorder %s583_s25, %s402_s26  ;;  %s407_s3 = scalar_lea.hbm %s634_s1, 256 }
  0x2d   : > { %p408_p5 = scmp.lt.s32.totalorder %s583_s25, %s634_s1  ;;  %p409_p6 = scmp.lt.s32.totalorder %s407_s3, %s402_s26 }
  0x2e   : > { %p405_p10 = pnand %p403_p9, %p376_p12 }
  0x2f   : > { %p410_p11 = por %p409_p6, %p408_p5 }
  0x30   : > { %p406_p4 = pneg %p405_p10 }
  0x32   : > { %p411_p13 = pnand %p410_p11, %p406_p4 }
  0x34   : > { %414 = shalt.err (!%p411_p13)
}
  0x35   : > { %s415_s6 = scalar_lea.vmem %s144_s30, 64  ;;  %s471_s19 = smov [#allocation4]  }
  0x36   : > { %p416_p1 = scmp.ne.s32.totalorder %s144_s30, %s415_s6  ;;  %s420_s7 = sshll.u32 %s471_s19, 4  ;;  %s421_s7 = int_to_ptr.vmem [resolvable:$false] %s420_s7 }
  0x37   : > { %s422_s8 = scalar_lea.vmem %s421_s7, 128  ;;  %p423_p9 = scmp.lt.s32.totalorder %s144_s30, %s421_s7 }
  0x38   : > { %p418_p0 = pnand %p416_p1, %p376_p12  ;;  %p424_p10 = scmp.lt.s32.totalorder %s422_s8, %s415_s6 }
  0x3a   : > { %p419_p2 = pneg %p418_p0  ;;  %p425_p7 = por %p424_p10, %p423_p9 }
  0x3c   : > { %p426_p3 = pnand %p425_p7, %p419_p2 }
  0x3e   : > { %429 = shalt.err (!%p426_p3)
}
  0x3f   : > { %334 = dma.hbm_to_vmem [thread:$0]  (!%p539_p8), %s583_s25, 64, %s144_s30, %s133_s24  }
  0x40   : > { %p642_p4 = scmp.ne.s32.totalorder %s641_s16, 0 }
  0x41   : > { %s154_s9 = sand.u32 (!%p642_p4), 1, %s460_s10   ;;  %p643_p12 = scmp.ne.s32.totalorder (!%p642_p4), %s637_s18, 0 }
  0x42   : > { %152 = sbr.rel (%p642_p4) target bundleno = 391 (0x187), region = 28  ;;  %s319_s15 = sshll.u32 (!%p642_p4), %s154_s9, 3 }
  0x43   : > { %s155_s20 = scalar_lea.sflag (!%p642_p4), [#allocation3], %s154_s9  ;;  %s158_s21 = scalar_lea.vmem (!%p642_p4), [#allocation2], %s319_s15 }
  0x47   : > { %447 = dma.done.wait (%p643_p12), %s155_s20, 128  }
  0x48   : > { %449 = vsyncadd (%p643_p12), %s155_s20, 4294967168  ;;  %s320_s22 = sshll.u32 %s154_s9, 2  ;;  %s164_s23 = scalar_lea.sflag [#allocation5], %s154_s9 }
  0x49   : > { %s167_s27 = scalar_lea.vmem [#allocation4], %s320_s22 }
  0x4a   : > { %451 = dma.done.wait (%p643_p12), %s164_s23, 64  }
  0x4b   : > { %453 = vsyncadd (%p643_p12), %s164_s23, 4294967232  ;;  %v196_v0 = vld [vmem:[%s158_s21] sm:$0xff]  ;;  %v197_v1 = vld [vmem:[%s167_s27] sm:$0xf]  ;;  %p192_p7 = scmp.lt.s32.totalorder %s506_s13, 3  ;;  %vm221_vm0 = vcmask 7168  }
  0x4c   : > { %199 = vmax.xlane.f32.xlu0 %v196_v0  ;;  %v198_v2 = vunpack.c.l.bf16 %v197_v1 }
  0x4d   : > { %s649_s13 = smov (!%p192_p7, %s506_s13), 3 }
  0x4e   : > { %s321_s18 = sshll.u32 %s649_s13, 3 }
  0x4f   : > { %s195_s29 = scalar_lea.vmem %s635_s2, %s321_s18 }
  0x50   : > { %205 = vadd.xlane.f32.xlu0 %v198_v2 }
  0xd5   : > { %v200_v3 = vpop.xlane.xlu0 %199 }
  0xd6   : > { %v201_v4 = vsub.f32 %v196_v0, %v200_v3 }
  0xd8   : > { %v202_v5 = vmul.f32 1.442695, %v201_v4 }
  0xd9   : > { %v206_v10 = vpop.xlane.xlu0 %205 }
  0xda   : > { %368 = vpow2.f32 %v202_v5  ;;  %v217_v11 = vsub.f32 128.0, %v206_v10 }
  0xdc   : > { %v218_v12 = vmul.f32 %v217_v11, %v206_v10 }
  0xe7   : > { %v369_v6 = vpop.eup %368 }
  0xe8   : > { %210 = vadd.xlane.f32.xlu1 %v369_v6  ;;  %370 = vrcp.f32 %v369_v6  ;;  %v212_v7 = vmul.f32 %v369_v6, %v198_v2 }
  0xe9   : > { %372 = vrcp.f32 %v218_v12 }
  0xec   : > { %213 = vadd.xlane.f32.xlu1 %v212_v7 }
  0xf5   : > { %v371_v8 = vpop.eup %370 }
  0xf6   : > { %v207_v9 = vmul.f32 %v371_v8, %v198_v2  ;;  %v373_v18 = vpop.eup %372 }
  0xf8   : > { %208 = vadd.xlane.f32.xlu0 %v207_v9 }
 0x171   : > { %v211_v13 = vpop.xlane.xlu1 %210 }
 0x175   : > { %v214_v14 = vpop.xlane.xlu1 %213 }
 0x176   : > { %v215_v15 = vsub.f32 %v211_v13, %v214_v14 }
 0x181   : > { %v209_v16 = vpop.xlane.xlu0 %208 }
 0x182   : > { %v216_v17 = vmul.f32 %v215_v15, %v209_v16 }
 0x184   : > { %v220_v19 = vmul.f32 %v373_v18, %v216_v17 }
 0x186   : > { %222 = vst.msk [vmem:[%s195_s29] sm:$0xff] %vm221_vm0, %v220_v19 }
 0x187 PF: > { %p15_p8 = scmp.ge.s32.totalorder %s509_s14, 6   ;;  %s644_s9 = smov %s460_s10 }
 0x188   : > { %s645_s10 = smov %s464_s11  ;;  %s646_s11 = smov %s519_s17 }
 0x189   : > { %s647_s12 = smov %s509_s14  ;;  %17 = sbr.rel (!%p15_p8) target bundleno = 5 (0x5), region = 81 }
 0x18e   :  { %242 = vsyncpa [#allocation3], 1 }
 0x18f   :  { %244 = vsyncpa [#allocation3 + $0x1], 1 }
 0x190   :  { %245 = vsyncpa [#allocation5], 1 }
 0x191   :  { %247 = vsyncpa [#allocation5 + $0x1], 1 }

</bundles_post_ra>
